<compile_context>
chip_gen: v7x
topology: tpu7x:2x2x1
jax: 0.10.0
libtpu: 0.0.40
codegen_flags: <defaults>
</compile_context>

<pallas_src>
import functools

import jax
import jax.numpy as jnp
from jax.experimental import pallas as pl
from jax.experimental.pallas import tpu as pltpu


def _depthwise_conv_kernel(x_ref, o_ref, *, taps, kh, kw, ho, wo):
    """One block of N planes per grid step.

    x_ref : VMEM (N, H, W)   pre-filtered input planes
    o_ref : VMEM (N, Ho, Wo) VALID cross-correlation output planes
    taps  : static nested tuple (KH, KW) of Python floats (shared filter)
    """
    x = x_ref[...]                                   # single load of the whole block
    n = x.shape[0]
    acc = jnp.zeros((n, ho, wo), jnp.float32)
    # KH, KW are tiny (e.g. 3x3) -> statically unrolled shifted MACs on the VPU.
    for i in range(kh):
        for j in range(kw):
            t = taps[i][j]
            if t == 0.0:                             # free dead-tap elimination
                continue
            acc = acc + x[:, i:i + ho, j:j + wo].astype(jnp.float32) * t
    # Output last dim is only Wo lanes wide at small image sizes (masked store),
    # but with all planes in one block that cost is paid once per kernel call.
    o_ref[...] = acc.astype(o_ref.dtype)


def _planes_per_step(num_planes, plane_in_bytes, plane_out_bytes,
                     budget_bytes=4 * 1024 * 1024):
    """Largest divisor of num_planes whose (in + out) block fits the VMEM budget."""
    per_plane = max(plane_in_bytes + plane_out_bytes, 1)
    n = max(1, min(num_planes, budget_bytes // per_plane))
    while num_planes % n:
        n -= 1
    return n


def depthwise_filter_conv(x, taps):
    """Grouped (groups=C) VALID cross-correlation, same filter for all channels.

    x    : (B, C, H, W)
    taps : static nested sequence (KH, KW) of floats
    returns (B, C, H-KH+1, W-KW+1)
    """
    B, C, H, W = x.shape
    taps = tuple(tuple(float(v) for v in row) for row in taps)
    KH, KW = len(taps), len(taps[0])
    Ho, Wo = H - KH + 1, W - KW + 1
    P = B * C

    n_planes = _planes_per_step(P, 4 * H * W, 4 * Ho * Wo)
    grid = (P // n_planes,)

    # TODO(synk): for very large planes (e.g. 2k x 2k, v7x's 64 MiB VMEM) add row
    # tiling with a (KH-1)-row halo instead of whole-plane blocks.

    kernel = functools.partial(
        _depthwise_conv_kernel, taps=taps, kh=KH, kw=KW, ho=Ho, wo=Wo)

    block_bytes = 4 * n_planes * (H * W + Ho * Wo)
    flops = 2 * KH * KW * P * Ho * Wo
    bytes_accessed = int(x.dtype.itemsize) * P * (H * W + Ho * Wo)

    out = pl.pallas_call(
        kernel,
        out_shape=jax.ShapeDtypeStruct((P, Ho, Wo), x.dtype),
        grid=grid,
        in_specs=[pl.BlockSpec((n_planes, H, W), lambda p: (p, 0, 0))],
        out_specs=pl.BlockSpec((n_planes, Ho, Wo), lambda p: (p, 0, 0)),
        compiler_params=pltpu.CompilerParams(
            # plane blocks are fully independent -> shard across v7x's 2 TCs
            dimension_semantics=("parallel",),
            # raise v5e's 16 MiB scoped default; blocks are budgeted well below this
            vmem_limit_bytes=max(32 * 1024 * 1024, 4 * block_bytes),
            # let XLA fuse the pre-filter (e.g. edge pad) into the kernel input
            allow_input_fusion=[True],
        ),
        cost_estimate=pl.CostEstimate(
            flops=flops, transcendentals=0, bytes_accessed=bytes_accessed),
    )(x.reshape(P, H, W))

    return out.reshape(B, C, Ho, Wo)


class FilterLayer:
    """JAX/Pallas analogue of CEMnet.Filter_Layer (3-channel grouped filter)."""

    def __init__(self, filt, pre_filter_func, post_filter_func=None):
        filt = jnp.asarray(filt, jnp.float32)
        # Mirror the torch weight of shape (3, 1, KH, KW): same non-trainable
        # filter tiled across the 3 channel groups.
        self.weight = jnp.tile(filt[None, None], (3, 1, 1, 1))
        # Non-trainable and fixed at construction -> bake taps as immediates.
        self._taps = tuple(tuple(float(v) for v in row) for row in filt.tolist())
        self.pre_filter_func = pre_filter_func
        self.post_filter_func = (lambda x: x) if post_filter_func is None else post_filter_func

    def __call__(self, x):
        # pre/post filter funcs are arbitrary user hooks -> plain JAX glue around
        # the Pallas depthwise conv (XLA may fuse them via allow_input_fusion).
        y = self.pre_filter_func(x)
        y = depthwise_filter_conv(y, self._taps)
        return self.post_filter_func(y)


if __name__ == "__main__":
    key = jax.random.PRNGKey(0)

    B, C, H, W = 2, 3, 16, 16          # module hard-codes 3 channels
    x = jax.random.normal(key, (B, C, H, W), dtype=jnp.float32)

    # deterministic non-trainable filter: 3x3 Gaussian blur (typical CEM usage)
    g = jnp.array([1.0, 2.0, 1.0], jnp.float32)
    filt = jnp.outer(g, g) / 16.0       # (3, 3)

    # typical CEM pre-filter: replication pad so spatial size is preserved
    kh, kw = filt.shape
    ph, pw = kh // 2, kw // 2
    pre = lambda t: jnp.pad(t, ((0, 0), (0, 0), (ph, ph), (pw, pw)), mode="edge")
    post = None  # identity, as in the module's default

    layer = FilterLayer(filt, pre_filter_func=pre, post_filter_func=post)
    fwd = jax.jit(layer.__call__)       # pad + pallas conv + post in one XLA program
    y = jax.block_until_ready(fwd(x))

    # reference: grouped conv via lax (NCHW / OIHW), feature_group_count = 3
    ref = jax.lax.conv_general_dilated(
        pre(x), layer.weight,
        window_strides=(1, 1), padding="VALID",
        dimension_numbers=("NCHW", "OIHW", "NCHW"),
        feature_group_count=3,
    )
    assert y.shape == (B, C, H, W), y.shape
    assert jnp.allclose(y, ref, atol=1e-5, rtol=1e-5), float(jnp.abs(y - ref).max())

    print("KERNEL_OK")
</pallas_src>

<mosaic_0001>
module attributes {stable_mosaic.version = 11 : i64} {
  func.func @_depthwise_conv_kernel(%arg0: i32, %arg1: memref<6x18x18xf32, #tpu.memory_space<vmem>>, %arg2: memref<6x16x16xf32, #tpu.memory_space<vmem>>) attributes {dimension_semantics = [#tpu.dimension_semantics<parallel>], iteration_bounds = array<i64: 1>, scalar_prefetch = 0 : i64, scratch_operands = 0 : i64, tpu.core_type = #tpu.core_type<tc>, window_params = [{transform_indices = @transform_0, window_bounds = array<i64: 6, 18, 18>}, {transform_indices = @transform_1, window_bounds = array<i64: 6, 16, 16>}]} {
    %c0 = arith.constant 0 : index
    %c0_0 = arith.constant 0 : index
    %c0_1 = arith.constant 0 : index
    %0 = vector.load %arg1[%c0, %c0_0, %c0_1] : memref<6x18x18xf32, #tpu.memory_space<vmem>>, vector<6x18x18xf32>
    %cst = arith.constant 0.000000e+00 : f32
    %1 = vector.broadcast %cst : f32 to vector<6x16x16xf32>
    %2 = vector.extract_strided_slice %0 {offsets = [0, 0, 0], sizes = [6, 16, 16], strides = [1, 1, 1]} : vector<6x18x18xf32> to vector<6x16x16xf32>
    %cst_2 = arith.constant 6.250000e-02 : f32
    %3 = vector.broadcast %cst_2 : f32 to vector<6x16x16xf32>
    %4 = arith.mulf %2, %3 : vector<6x16x16xf32>
    %5 = arith.addf %1, %4 : vector<6x16x16xf32>
    %6 = vector.extract_strided_slice %0 {offsets = [0, 0, 1], sizes = [6, 16, 16], strides = [1, 1, 1]} : vector<6x18x18xf32> to vector<6x16x16xf32>
    %cst_3 = arith.constant 1.250000e-01 : f32
    %7 = vector.broadcast %cst_3 : f32 to vector<6x16x16xf32>
    %8 = arith.mulf %6, %7 : vector<6x16x16xf32>
    %9 = arith.addf %5, %8 : vector<6x16x16xf32>
    %10 = vector.extract_strided_slice %0 {offsets = [0, 0, 2], sizes = [6, 16, 16], strides = [1, 1, 1]} : vector<6x18x18xf32> to vector<6x16x16xf32>
    %cst_4 = arith.constant 6.250000e-02 : f32
    %11 = vector.broadcast %cst_4 : f32 to vector<6x16x16xf32>
    %12 = arith.mulf %10, %11 : vector<6x16x16xf32>
    %13 = arith.addf %9, %12 : vector<6x16x16xf32>
    %14 = vector.extract_strided_slice %0 {offsets = [0, 1, 0], sizes = [6, 16, 16], strides = [1, 1, 1]} : vector<6x18x18xf32> to vector<6x16x16xf32>
    %cst_5 = arith.constant 1.250000e-01 : f32
    %15 = vector.broadcast %cst_5 : f32 to vector<6x16x16xf32>
    %16 = arith.mulf %14, %15 : vector<6x16x16xf32>
    %17 = arith.addf %13, %16 : vector<6x16x16xf32>
    %18 = vector.extract_strided_slice %0 {offsets = [0, 1, 1], sizes = [6, 16, 16], strides = [1, 1, 1]} : vector<6x18x18xf32> to vector<6x16x16xf32>
    %cst_6 = arith.constant 2.500000e-01 : f32
    %19 = vector.broadcast %cst_6 : f32 to vector<6x16x16xf32>
    %20 = arith.mulf %18, %19 : vector<6x16x16xf32>
    %21 = arith.addf %17, %20 : vector<6x16x16xf32>
    %22 = vector.extract_strided_slice %0 {offsets = [0, 1, 2], sizes = [6, 16, 16], strides = [1, 1, 1]} : vector<6x18x18xf32> to vector<6x16x16xf32>
    %cst_7 = arith.constant 1.250000e-01 : f32
    %23 = vector.broadcast %cst_7 : f32 to vector<6x16x16xf32>
    %24 = arith.mulf %22, %23 : vector<6x16x16xf32>
    %25 = arith.addf %21, %24 : vector<6x16x16xf32>
    %26 = vector.extract_strided_slice %0 {offsets = [0, 2, 0], sizes = [6, 16, 16], strides = [1, 1, 1]} : vector<6x18x18xf32> to vector<6x16x16xf32>
    %cst_8 = arith.constant 6.250000e-02 : f32
    %27 = vector.broadcast %cst_8 : f32 to vector<6x16x16xf32>
    %28 = arith.mulf %26, %27 : vector<6x16x16xf32>
    %29 = arith.addf %25, %28 : vector<6x16x16xf32>
    %30 = vector.extract_strided_slice %0 {offsets = [0, 2, 1], sizes = [6, 16, 16], strides = [1, 1, 1]} : vector<6x18x18xf32> to vector<6x16x16xf32>
    %cst_9 = arith.constant 1.250000e-01 : f32
    %31 = vector.broadcast %cst_9 : f32 to vector<6x16x16xf32>
    %32 = arith.mulf %30, %31 : vector<6x16x16xf32>
    %33 = arith.addf %29, %32 : vector<6x16x16xf32>
    %34 = vector.extract_strided_slice %0 {offsets = [0, 2, 2], sizes = [6, 16, 16], strides = [1, 1, 1]} : vector<6x18x18xf32> to vector<6x16x16xf32>
    %cst_10 = arith.constant 6.250000e-02 : f32
    %35 = vector.broadcast %cst_10 : f32 to vector<6x16x16xf32>
    %36 = arith.mulf %34, %35 : vector<6x16x16xf32>
    %37 = arith.addf %33, %36 : vector<6x16x16xf32>
    %c0_11 = arith.constant 0 : index
    %c0_12 = arith.constant 0 : index
    %c0_13 = arith.constant 0 : index
    %38 = vector.load %arg2[%c0_11, %c0_12, %c0_13] : memref<6x16x16xf32, #tpu.memory_space<vmem>>, vector<6x16x16xf32>
    tpu.vector_store %arg2[%c0_11, %c0_12, %c0_13], %37 {strides = array<i32>} : memref<6x16x16xf32, #tpu.memory_space<vmem>>, vector<6x16x16xf32>,
    return
  }
  func.func @transform_0(%arg0: i32) -> (i32, i32, i32) {
    %c0_i32 = arith.constant 0 : i32
    %c0_i32_0 = arith.constant 0 : i32
    %c0_i32_1 = arith.constant 0 : i32
    return %arg0, %c0_i32, %c0_i32_0 : i32, i32, i32
  }
  func.func @transform_1(%arg0: i32) -> (i32, i32, i32) {
    %c0_i32 = arith.constant 0 : i32
    %c0_i32_0 = arith.constant 0 : i32
    %c0_i32_1 = arith.constant 0 : i32
    return %arg0, %c0_i32, %c0_i32_0 : i32, i32, i32
  }
}

</mosaic_0001>

<bundles_post_ra>
// kernel: a_call__.1
= control target key start
LH: loop header
LB: loop body
LE: loop exit
PB: predicated region body
PF: predicated region fallthrough
CT: control target
= control target key end

     0   :  { %s663_s14 = smov 127   ;;  %s1266_s0 = inlined_call_operand.vmem [shape: f32[6,18,18], index: 0, kind: input, shape index: {}]   ;;  %s1267_s1 = inlined_call_operand.hbm [shape: f32[6,16,16], index: 1, kind: output, shape index: {}]  }
   0x1   :  { %v681_v0 = vld [vmem:[%s1266_s0 + $0x18] sm:$0xff]  ;;  %v686_v1 = vld [vmem:[%s1266_s0] sm:$0xff]  ;;  %v702_v5 = vld [vmem:[%s1266_s0 + $0x8] sm:$0xff] }
   0x2   :  { %v691_v2 = vld [vmem:[%s1266_s0 + $0x20] sm:$0xff]  ;;  %v694_v3 = vmul.f32 0.125, %v681_v0  ;;  %v697_v4 = vmul.f32 0.125, %v686_v1  ;;  %v712_v7 = vmul.f32 0.125, %v702_v5  ;;  %v717_v8 = vld [vmem:[%s1266_s0 + $0x38] sm:$0xff]  ;;  %v722_v9 = vld [vmem:[%s1266_s0 + $0x30] sm:$0xff] }
   0x3   :  { %v709_v6 = vmul.f32 0.125, %v691_v2  ;;  %v729_v10 = vmul.f32 0.125, %v717_v8  ;;  %v732_v11 = vmul.f32 0.125, %v722_v9  ;;  %v737_v12 = vld [vmem:[%s1266_s0 + $0x50] sm:$0xff]  ;;  %v742_v13 = vld [vmem:[%s1266_s0 + $0x48] sm:$0xff] }
   0x4   :  { %79 = vrot.lane.b32.xlu1 %v694_v3, %s663_s14  ;;  %75 = vrot.lane.b32.xlu0 %v697_v4, %s663_s14  ;;  %v749_v14 = vmul.f32 0.125, %v737_v12  ;;  %v57_v15 = vmul.f32 0.125, %v742_v13 }
   0x8   :  { %81 = vrot.lane.b32.xlu1 %v709_v6, %s663_s14  ;;  %77 = vrot.lane.b32.xlu0 %v712_v7, %s663_s14 }
   0xc   :  { %85 = vrot.lane.b32.xlu1 %v729_v10, %s663_s14  ;;  %83 = vrot.lane.b32.xlu0 %v732_v11, %s663_s14 }
   0xd   :  { %6 = vsyncpa [#allocation3], 0  ;;  %v755_v16 = vld [vmem:[%s1266_s0 + $0x68] sm:$0xff]  ;;  %v760_v17 = vld [vmem:[%s1266_s0 + $0x60] sm:$0xff]  ;;  %v197_v24 = vrot.slane %v712_v7, 1  ;;  %v196_v25 = vrot.slane %v697_v4, 1 }
   0xe   :  { %v766_v18 = vmul.f32 0.125, %v755_v16  ;;  %v59_v19 = vmul.f32 0.125, %v760_v17  ;;  %v772_v20 = vld [vmem:[%s1266_s0 + $0x80] sm:$0xff]  ;;  %v777_v21 = vld [vmem:[%s1266_s0 + $0x78] sm:$0xff]  ;;  %vm195_vm0 = vcmask 1046528   ;;  %v202_v26 = vrot.slane %v709_v6, 1 }
   0xf   :  { %v783_v22 = vmul.f32 0.125, %v772_v20  ;;  %v61_v23 = vmul.f32 0.125, %v777_v21  ;;  %v201_v27 = vrot.slane %v694_v3, 1  ;;  %v793_v28 = vsel %vm195_vm0, %v196_v25, %v197_v24  ;;  %s664_s2 = smov 126  }
  0x10   :  { %89 = vrot.lane.b32.xlu1 %v749_v14, %s663_s14  ;;  %87 = vrot.lane.b32.xlu0 %v57_v15, %s663_s14  ;;  %v207_v30 = vrot.slane %v729_v10, 1  ;;  %v206_v31 = vrot.slane %v732_v11, 1  ;;  %v806_v32 = vmul.f32 0.0625, %v702_v5  ;;  %v809_v33 = vmul.f32 0.0625, %v686_v1 }
  0x11   :  { %v798_v29 = vsel %vm195_vm0, %v201_v27, %v202_v26  ;;  %v212_v34 = vrot.slane %v749_v14, 1  ;;  %v211_v36 = vrot.slane %v57_v15, 1  ;;  %v217_v37 = vrot.slane %v766_v18, 1 }
  0x12   :  { %v815_v35 = vsel %vm195_vm0, %v206_v31, %v207_v30  ;;  %v216_v38 = vrot.slane %v59_v19, 1  ;;  %v222_v40 = vrot.slane %v783_v22, 1  ;;  %v221_v41 = vrot.slane %v61_v23, 1 }
  0x13   :  { %v821_v39 = vsel %vm195_vm0, %v211_v36, %v212_v34  ;;  %v829_v42 = vmul.f32 0.0625, %v691_v2  ;;  %v832_v43 = vmul.f32 0.0625, %v681_v0  ;;  %vm424_vm1 = vcmask 1045504  }
  0x14   :  { %93 = vrot.lane.b32.xlu1 %v766_v18, %s663_s14  ;;  %91 = vrot.lane.b32.xlu0 %v59_v19, %s663_s14  ;;  %v837_v44 = vsel %vm195_vm0, %v216_v38, %v217_v37  ;;  %v842_v45 = vsel %vm195_vm0, %v221_v41, %v222_v40  ;;  %v480_v46 = vrot.slane %v712_v7, 2  ;;  %v479_v47 = vrot.slane %v697_v4, 2  ;;  %v924_v38 = vld [vmem:[%s1266_s0 + $0x28] sm:$0x3] }
  0x15   :  { %v1272_v48 = vrot.slane %v709_v6, 2  ;;  %v848_v49 = vmul.f32 0.0625, %v717_v8  ;;  %v484_v50 = vrot.slane %v694_v3, 2  ;;  %v1271_v51 = vrot.slane %v729_v10, 2 }
  0x16   :  { %v857_v52 = vmul.f32 0.0625, %v722_v9  ;;  %v862_v53 = vsel %vm424_vm1, %v479_v47, %v480_v46  ;;  %v489_v54 = vrot.slane %v732_v11, 2  ;;  %v1270_v55 = vrot.slane %v749_v14, 2 }
  0x17   :  { %v869_v56 = vsel %vm424_vm1, %v484_v50, %v1272_v48  ;;  %v494_v57 = vrot.slane %v57_v15, 2  ;;  %v1269_v59 = vrot.slane %v766_v18, 2  ;;  %v499_v60 = vrot.slane %v59_v19, 2  ;;  %v901_v15 = vld [vmem:[%s1266_s0 + $0x10] sm:$0x3] }
  0x18   :  { %97 = vrot.lane.b32.xlu1 %v783_v22, %s663_s14  ;;  %95 = vrot.lane.b32.xlu0 %v61_v23, %s663_s14  ;;  %v874_v58 = vsel %vm424_vm1, %v489_v54, %v1271_v51  ;;  %v1268_v62 = vrot.slane %v783_v22, 2  ;;  %v888_v63 = vmul.f32 0.0625, %v737_v12  ;;  %v891_v3 = vmul.f32 0.0625, %v742_v13  ;;  %v968_v48 = vld [vmem:[%s1266_s0 + $0x70] sm:$0x3] }
  0x19   :  { %v880_v61 = vsel %vm424_vm1, %v494_v57, %v1270_v55  ;;  %v896_v4 = vsel %vm424_vm1, %v499_v60, %v1269_v59  ;;  %v504_v11 = vrot.slane %v61_v23, 2  ;;  %v913_v25 = vmul.f32 0.0625, %v755_v16 }
  0x1a   :  { %v916_v23 = vmul.f32 0.0625, %v760_v17  ;;  %v251_v27 = vmul.f32 0.25, %v702_v5  ;;  %v252_v31 = vmul.f32 0.25, %v901_v15  ;;  %v250_v36 = vmul.f32 0.25, %v686_v1 }
  0x1b   :  { %v906_v19 = vsel %vm424_vm1, %v504_v11, %v1268_v62  ;;  %v927_v41 = vmul.f32 0.0625, %v772_v20  ;;  %v934_v5 = vmul.f32 0.0625, %v777_v21  ;;  %v254_v47 = vmul.f32 0.25, %v691_v2  ;;  %v942_v11 = vld [vmem:[%s1266_s0 + $0x40] sm:$0x3] }
  0x1c   :  { %137 = vrot.lane.b32.xlu1 %v806_v32, %s664_s2  ;;  %135 = vrot.lane.b32.xlu0 %v809_v33, %s664_s2  ;;  %v255_v1 = vmul.f32 0.25, %v924_v38  ;;  %v253_v50 = vmul.f32 0.25, %v681_v0  ;;  %v287_v54 = vrot.slane %v251_v27, 1  ;;  %v289_v57 = vrot.slane %v252_v31, 1 }
  0x1d   :  { %v286_v60 = vrot.slane %v250_v36, 1  ;;  %v257_v62 = vmul.f32 0.25, %v717_v8  ;;  %v292_v2 = vrot.slane %v254_v47, 1  ;;  %v258_v0 = vmul.f32 0.25, %v942_v11  ;;  %v956_v8 = vld [vmem:[%s1266_s0 + $0x58] sm:$0x3] }
  0x1e   :  { %v294_v59 = vrot.slane %v255_v1, 1  ;;  %v291_v55 = vrot.slane %v253_v50, 1  ;;  %v290_v27 = vsel %vm195_vm0, %v287_v54, %v289_v57  ;;  %v256_v36 = vmul.f32 0.25, %v722_v9 }
  0x1f   :  { %v288_v31 = vsel %vm195_vm0, %v286_v60, %v287_v54  ;;  %v297_v50 = vrot.slane %v257_v62, 1  ;;  %v299_v51 = vrot.slane %v258_v0, 1  ;;  %v260_v54 = vmul.f32 0.25, %v737_v12 }
  0x20   :  { %141 = vrot.lane.b32.xlu1 %v829_v42, %s664_s2  ;;  %139 = vrot.lane.b32.xlu0 %v832_v43, %s664_s2  ;;  %v295_v47 = vsel %vm195_vm0, %v292_v2, %v294_v59  ;;  %v293_v1 = vsel %vm195_vm0, %v291_v55, %v292_v2  ;;  %v296_v57 = vrot.slane %v256_v36, 1  ;;  %v261_v9 = vmul.f32 0.25, %v956_v8 }
  0x21   :  { %v259_v60 = vmul.f32 0.25, %v742_v13  ;;  %v300_v55 = vsel %vm195_vm0, %v297_v50, %v299_v51  ;;  %v263_v59 = vmul.f32 0.25, %v755_v16  ;;  %v264_v62 = vmul.f32 0.25, %v968_v48 }
  0x22   :  { %v262_v12 = vmul.f32 0.25, %v760_v17  ;;  %v298_v2 = vsel %vm195_vm0, %v296_v57, %v297_v50  ;;  %v302_v13 = vrot.slane %v260_v54, 1  ;;  %v304_v0 = vrot.slane %v261_v9, 1 }
  0x23   :  { %v307_v51 = vrot.slane %v263_v59, 1  ;;  %v309_v16 = vrot.slane %v264_v62, 1  ;;  %v265_v57 = vmul.f32 0.25, %v777_v21  ;;  %v1274_v7 = vrot.slane %v729_v10, 2 }
  0x24   :  { %145 = vrot.lane.b32.xlu1 %v848_v49, %s664_s2  ;;  %143 = vrot.lane.b32.xlu0 %v857_v52, %s664_s2  ;;  %v306_v36 = vrot.slane %v262_v12, 1  ;;  %v305_v17 = vsel %vm195_vm0, %v302_v13, %v304_v0  ;;  %v1276_v10 = vrot.slane %v766_v18, 2  ;;  %v413_v18 = vmul.f32 0.0625, %v924_v38 }
  0x25   :  { %v310_v54 = vsel %vm195_vm0, %v307_v51, %v309_v16  ;;  %v311_v59 = vrot.slane %v265_v57, 1  ;;  %vm605_vm2 = vcmask 130048  }
  0x28   :  { %149 = vrot.lane.b32.xlu1 %v888_v63, %s664_s2  ;;  %147 = vrot.lane.b32.xlu0 %v891_v3, %s664_s2 }
  0x2c   :  { %153 = vrot.lane.b32.xlu1 %v913_v25, %s664_s2  ;;  %151 = vrot.lane.b32.xlu0 %v916_v23, %s664_s2 }
  0x30   :  { %157 = vrot.lane.b32.xlu1 %v927_v41, %s664_s2  ;;  %155 = vrot.lane.b32.xlu0 %v934_v5, %s664_s2 }
  0x34   :  { %318 = vrot.lane.b32.xlu1 %v290_v27, %s663_s14  ;;  %316 = vrot.lane.b32.xlu0 %v288_v31, %s663_s14  ;;  %v301_v27 = vrot.slane %v259_v60, 1  ;;  %v980_v31 = vld [vmem:[%s1266_s0 + $0x88] sm:$0x3]  ;;  %v308_v60 = vsel %vm195_vm0, %v306_v36, %v307_v51  ;;  %v186_v36 = vmul.f32 0.125, %v956_v8  ;;  %s665_s0 = smov [#allocation2]  }
  0x35   :  { %v267_v50 = vmul.f32 0.25, %v980_v31 }
  0x38   :  { %322 = vrot.lane.b32.xlu1 %v295_v47, %s663_s14  ;;  %320 = vrot.lane.b32.xlu0 %v293_v1, %s663_s14  ;;  %v266_v47 = vmul.f32 0.25, %v772_v20  ;;  %v303_v1 = vsel %vm195_vm0, %v301_v27, %v302_v13  ;;  %v183_v20 = vmul.f32 0.125, %v901_v15  ;;  %v185_v27 = vmul.f32 0.125, %v942_v11 }
  0x3a   :  { %v312_v9 = vrot.slane %v266_v47, 1  ;;  %v199_v12 = vrot.slane %v183_v20, 1  ;;  %v209_v16 = vrot.slane %v185_v27, 1  ;;  %v214_v47 = vrot.slane %v186_v36, 1 }
  0x3c   :  { %326 = vrot.lane.b32.xlu1 %v300_v55, %s663_s14  ;;  %324 = vrot.lane.b32.xlu0 %v298_v2, %s663_s14  ;;  %v314_v55 = vrot.slane %v267_v50, 1  ;;  %v313_v21 = vsel %vm195_vm0, %v311_v59, %v312_v9  ;;  %v184_v2 = vmul.f32 0.125, %v924_v38  ;;  %v1004_v13 = vsel %vm195_vm0, %v197_v24, %v199_v12 }
  0x3d   :  { %v1024_v24 = vsel %vm195_vm0, %v207_v30, %v209_v16  ;;  %v188_v50 = vmul.f32 0.125, %v980_v31  ;;  %v497_v59 = vrot.slane %v186_v36, 2  ;;  %v426_v12 = vrot.slane %v806_v32, 2 }
  0x3e   :  { %v315_v62 = vsel %vm195_vm0, %v312_v9, %v314_v55  ;;  %v204_v0 = vrot.slane %v184_v2, 1  ;;  %v487_v9 = vrot.slane %v184_v2, 2  ;;  %v492_v55 = vrot.slane %v185_v27, 2 }
  0x3f   :  { %v224_v57 = vrot.slane %v188_v50, 1  ;;  %v433_v36 = vrot.slane %v413_v18, 2  ;;  %v414_v38 = vmul.f32 0.0625, %v942_v11  ;;  %v415_v11 = vmul.f32 0.0625, %v956_v8 }
  0x40   :  { %330 = vrot.lane.b32.xlu1 %v305_v17, %s663_s14  ;;  %328 = vrot.lane.b32.xlu0 %v303_v1, %s663_s14  ;;  %v1014_v51 = vsel %vm195_vm0, %v202_v26, %v204_v0  ;;  %v187_v17 = vmul.f32 0.125, %v968_v48  ;;  %v1034_v26 = vsel %vm195_vm0, %v212_v34, %v214_v47  ;;  %v416_v8 = vmul.f32 0.0625, %v968_v48 }
  0x41   :  { %v1053_v34 = vsel %vm195_vm0, %v222_v40, %v224_v57  ;;  %v1273_v40 = vrot.slane %v709_v6, 2  ;;  %v1275_v6 = vrot.slane %v749_v14, 2  ;;  %v1277_v14 = vrot.slane %v783_v22, 2 }
  0x42   :  { %v219_v1 = vrot.slane %v187_v17, 1  ;;  %v430_v22 = vrot.slane %v832_v43, 2  ;;  %v438_v57 = vrot.slane %v414_v38, 2  ;;  %v417_v48 = vmul.f32 0.0625, %v980_v31 }
  0x43   :  { %v450_v18 = vrot.slane %v934_v5, 2 }
  0x44   :  { %334 = vrot.lane.b32.xlu1 %v310_v54, %s663_s14  ;;  %332 = vrot.lane.b32.xlu0 %v308_v60, %s663_s14  ;;  %v1044_v30 = vsel %vm195_vm0, %v217_v37, %v219_v1  ;;  %v482_v54 = vrot.slane %v183_v20, 2  ;;  %v488_v60 = vsel %vm424_vm1, %v1273_v40, %v487_v9  ;;  %v502_v20 = vrot.slane %v187_v17, 2 }
  0x45   :  { %v436_v1 = vrot.slane %v848_v49, 2  ;;  %v441_v40 = vrot.slane %v888_v63, 2 }
  0x46   :  { %v483_v37 = vsel %vm424_vm1, %v480_v46, %v482_v54  ;;  %v493_v46 = vsel %vm424_vm1, %v1274_v7, %v492_v55  ;;  %v435_v54 = vrot.slane %v857_v52, 2 }
  0x47   :  { %v1130_v55 = vsel %vm424_vm1, %v436_v1, %v438_v57 }
  0x48   :  { %338 = vrot.lane.b32.xlu1 %v315_v62, %s663_s14  ;;  %336 = vrot.lane.b32.xlu0 %v313_v21, %s663_s14  ;;  %v503_v62 = vsel %vm424_vm1, %v1276_v10, %v502_v20  ;;  %v412_v21 = vmul.f32 0.0625, %v901_v15  ;;  %v1133_v7 = vsel %vm424_vm1, %v435_v54, %v436_v1  ;;  %v446_v20 = vrot.slane %v913_v25, 2 }
  0x49   :  { %v448_v10 = vrot.slane %v416_v8, 2 }
  0x4a   :  { %v428_v2 = vrot.slane %v412_v21, 2 }
  0x4c   :  { %366 = vrot.lane.b32.xlu1 %v1004_v13, %s664_s2  ;;  %364 = vrot.lane.b32.xlu0 %v793_v28, %s664_s2  ;;  %v1104_v15 = vsel %vm424_vm1, %v426_v12, %v428_v2 }
  0x50   :  { %370 = vrot.lane.b32.xlu1 %v1014_v51, %s664_s2  ;;  %368 = vrot.lane.b32.xlu0 %v798_v29, %s664_s2 }
  0x54   :  { %374 = vrot.lane.b32.xlu1 %v1024_v24, %s664_s2  ;;  %372 = vrot.lane.b32.xlu0 %v815_v35, %s664_s2 }
  0x58   :  { %378 = vrot.lane.b32.xlu1 %v1034_v26, %s664_s2  ;;  %376 = vrot.lane.b32.xlu0 %v821_v39, %s664_s2 }
  0x5c   :  { %382 = vrot.lane.b32.xlu1 %v1044_v30, %s664_s2  ;;  %380 = vrot.lane.b32.xlu0 %v837_v44, %s664_s2 }
  0x60   :  { %386 = vrot.lane.b32.xlu1 %v1053_v34, %s664_s2  ;;  %384 = vrot.lane.b32.xlu0 %v842_v45, %s664_s2 }
  0x64   :  { %511 = vrot.lane.b32.xlu1 %v483_v37, %s663_s14  ;;  %509 = vrot.lane.b32.xlu0 %v862_v53, %s663_s14  ;;  %v498_v53 = vsel %vm424_vm1, %v1275_v6, %v497_v59 }
  0x68   :  { %515 = vrot.lane.b32.xlu1 %v488_v60, %s663_s14  ;;  %513 = vrot.lane.b32.xlu0 %v869_v56, %s663_s14  ;;  %v507_v56 = vrot.slane %v188_v50, 2  ;;  %v440_v60 = vrot.slane %v891_v3, 2 }
  0x6c   :  { %519 = vrot.lane.b32.xlu1 %v493_v46, %s663_s14  ;;  %517 = vrot.lane.b32.xlu0 %v874_v58, %s663_s14  ;;  %v508_v58 = vsel %vm424_vm1, %v1277_v14, %v507_v56  ;;  %v443_v46 = vrot.slane %v415_v11, 2 }
  0x6e   :  { %v1145_v56 = vsel %vm424_vm1, %v441_v40, %v443_v46 }
  0x70   :  { %523 = vrot.lane.b32.xlu1 %v498_v53, %s663_s14  ;;  %521 = vrot.lane.b32.xlu0 %v880_v61, %s663_s14  ;;  %v425_v61 = vrot.slane %v809_v33, 2  ;;  %v1141_v53 = vsel %vm424_vm1, %v440_v60, %v441_v40 }
  0x72   :  { %v1107_v16 = vsel %vm424_vm1, %v425_v61, %v426_v12  ;;  %v1155_v12 = vsel %vm424_vm1, %v446_v20, %v448_v10  ;;  %v453_v61 = vrot.slane %v417_v48, 2 }
  0x74   :  { %527 = vrot.lane.b32.xlu1 %v503_v62, %s663_s14  ;;  %525 = vrot.lane.b32.xlu0 %v896_v4, %s663_s14  ;;  %v431_v4 = vrot.slane %v829_v42, 2  ;;  %v445_v62 = vrot.slane %v916_v23, 2 }
  0x76   :  { %v1096_v0 = vpop.permute.xlu1 %79  ;;  %v76_v27 = vpop.permute.xlu0 %75  ;;  %v1119_v50 = vsel %vm424_vm1, %v431_v4, %v433_v36  ;;  %v1158_v2 = vsel %vm424_vm1, %v445_v62, %v446_v20 }
  0x78   :  { %531 = vrot.lane.b32.xlu1 %v508_v58, %s663_s14  ;;  %529 = vrot.lane.b32.xlu0 %v906_v19, %s663_s14  ;;  %v1115_v19 = vsel %vm424_vm1, %v430_v22, %v431_v4  ;;  %v451_v58 = vrot.slane %v927_v41, 2  ;;  %v111_v22 = vadd.f32 %v76_v27, %v809_v33  ;;  %v113_v33 = vadd.f32 %v1096_v0, %v832_v43  ;;  %s623_s14 = sshll.u32 %s665_s0, 4  ;;  %s624_s14 = int_to_ptr.vmem [resolvable:$true] %s623_s14 }
  0x79   :  { %s639_s16 = scalar_lea.vmem %s624_s14, 1536  ;;  %p644_p1 = scmp.lt.s32.totalorder %s624_s14, %s624_s14 }
  0x7a   :  { %v82_v47 = vpop.permute.xlu1 %81  ;;  %v78_v17 = vpop.permute.xlu0 %77  ;;  %v1168_v38 = vsel %vm424_vm1, %v451_v58, %v453_v61  ;;  %v1171_v1 = vsel %vm424_vm1, %v450_v18, %v451_v58  ;;  %p640_p0 = scmp.ne.s32.totalorder %s624_s14, %s639_s16  ;;  %p645_p2 = scmp.lt.s32.totalorder %s639_s16, %s639_s16 }
  0x7b   :  { %v112_v36 = vadd.f32 %v78_v17, %v806_v32  ;;  %v114_v32 = vadd.f32 %v82_v47, %v829_v42 }
  0x7c   :  { %559 = vrot.lane.b32.xlu1 %v1104_v15, %s664_s2  ;;  %557 = vrot.lane.b32.xlu0 %v1107_v16, %s664_s2  ;;  %p646_p3 = por %p645_p2, %p644_p1 }
  0x7e   :  { %v86_v37 = vpop.permute.xlu1 %85  ;;  %v84_v9 = vpop.permute.xlu0 %83  ;;  %p647_p4 = pnand %p646_p3, %p640_p0 }
  0x7f   :  { %v116_v8 = vadd.f32 %v86_v37, %v848_v49  ;;  %v115_v20 = vadd.f32 %v84_v9, %v857_v52 }
  0x80   :  { %563 = vrot.lane.b32.xlu1 %v1119_v50, %s664_s2  ;;  %561 = vrot.lane.b32.xlu0 %v1115_v19, %s664_s2 }
  0x82   :  { %v90_v59 = vpop.permute.xlu1 %89  ;;  %v88_v6 = vpop.permute.xlu0 %87 }
  0x83   :  { %v118_v61 = vadd.f32 %v90_v59, %v888_v63  ;;  %v117_v18 = vadd.f32 %v88_v6, %v891_v3 }
  0x84   :  { %567 = vrot.lane.b32.xlu1 %v1130_v55, %s664_s2  ;;  %565 = vrot.lane.b32.xlu0 %v1133_v7, %s664_s2 }
  0x86   :  { %v94_v21 = vpop.permute.xlu1 %93  ;;  %v92_v14 = vpop.permute.xlu0 %91 }
  0x87   :  { %v120_v47 = vadd.f32 %v94_v21, %v913_v25 }
  0x88   :  { %571 = vrot.lane.b32.xlu1 %v1145_v56, %s664_s2  ;;  %569 = vrot.lane.b32.xlu0 %v1141_v53, %s664_s2 }
  0x8a   :  { %v98_v31 = vpop.permute.xlu1 %97  ;;  %v96_v4 = vpop.permute.xlu0 %95 }
  0x8b   :  { %v122_v9 = vadd.f32 %v98_v31, %v927_v41 }
  0x8c   :  { %575 = vrot.lane.b32.xlu1 %v1155_v12, %s664_s2  ;;  %573 = vrot.lane.b32.xlu0 %v1158_v2, %s664_s2 }
  0x8e   :  { %v138_v57 = vpop.permute.xlu1 %137  ;;  %v136_v54 = vpop.permute.xlu0 %135 }
  0x8f   :  { %v172_v11 = vadd.f32 %v138_v57, %v112_v36  ;;  %v171_v40 = vadd.f32 %v136_v54, %v111_v22  ;;  %v119_v36 = vadd.f32 %v92_v14, %v916_v23  ;;  %v121_v54 = vadd.f32 %v96_v4, %v934_v5 }
  0x90   :  { %579 = vrot.lane.b32.xlu1 %v1168_v38, %s664_s2  ;;  %577 = vrot.lane.b32.xlu0 %v1171_v1, %s664_s2 }
  0x91   :  { %v239_v6 = vadd.f32 %v1004_v13, %v172_v11 }
  0x92   :  { %v142_v27 = vpop.permute.xlu1 %141  ;;  %v140_v17 = vpop.permute.xlu0 %139 }
  0x93   :  { %v174_v60 = vadd.f32 %v142_v27, %v114_v32  ;;  %v173_v46 = vadd.f32 %v140_v17, %v113_v33  ;;  %v238_v32 = vadd.f32 %v793_v28, %v171_v40 }
  0x95   :  { %v241_v14 = vadd.f32 %v1014_v51, %v174_v60  ;;  %v240_v17 = vadd.f32 %v798_v29, %v173_v46 }
  0x96   :  { %v146_v10 = vpop.permute.xlu1 %145  ;;  %v144_v62 = vpop.permute.xlu0 %143 }
  0x97   :  { %v176_v48 = vadd.f32 %v146_v10, %v116_v8  ;;  %v175_v58 = vadd.f32 %v144_v62, %v115_v20 }
  0x99   :  { %v243_v4 = vadd.f32 %v1024_v24, %v176_v48  ;;  %v242_v20 = vadd.f32 %v815_v35, %v175_v58 }
  0x9a   :  { %v150_v22 = vpop.permute.xlu1 %149  ;;  %v148_v43 = vpop.permute.xlu0 %147 }
  0x9b   :  { %v178_v0 = vadd.f32 %v150_v22, %v118_v61  ;;  %v177_v42 = vadd.f32 %v148_v43, %v117_v18 }
  0x9d   :  { %v245_v40 = vadd.f32 %v1034_v26, %v178_v0  ;;  %v244_v62 = vadd.f32 %v821_v39, %v177_v42 }
  0x9e   :  { %v154_v57 = vpop.permute.xlu1 %153  ;;  %v152_v49 = vpop.permute.xlu0 %151 }
  0x9f   :  { %v180_v37 = vadd.f32 %v154_v57, %v120_v47  ;;  %v179_v52 = vadd.f32 %v152_v49, %v119_v36 }
  0xa1   :  { %v247_v46 = vadd.f32 %v1044_v30, %v180_v37  ;;  %v246_v24 = vadd.f32 %v837_v44, %v179_v52 }
  0xa2   :  { %v158_v33 = vpop.permute.xlu1 %157  ;;  %v156_v63 = vpop.permute.xlu0 %155 }
  0xa3   :  { %v182_v59 = vadd.f32 %v158_v33, %v122_v9  ;;  %v181_v3 = vadd.f32 %v156_v63, %v121_v54 }
  0xa5   :  { %v249_v26 = vadd.f32 %v1053_v34, %v182_v59  ;;  %v248_v39 = vadd.f32 %v842_v45, %v181_v3 }
  0xa6   :  { %v319_v27 = vpop.permute.xlu1 %318  ;;  %v317_v25 = vpop.permute.xlu0 %316 }
  0xa7   :  { %v353_v21 = vadd.f32 %v319_v27, %v239_v6  ;;  %v352_v23 = vadd.f32 %v317_v25, %v238_v32 }
  0xaa   :  { %v323_v8 = vpop.permute.xlu1 %322  ;;  %v321_v41 = vpop.permute.xlu0 %320 }
  0xab   :  { %v355_v31 = vadd.f32 %v323_v8, %v241_v14  ;;  %v354_v5 = vadd.f32 %v321_v41, %v240_v17 }
  0xae   :  { %v327_v10 = vpop.permute.xlu1 %326  ;;  %v325_v13 = vpop.permute.xlu0 %324 }
  0xaf   :  { %v357_v11 = vadd.f32 %v327_v10, %v243_v4  ;;  %v356_v28 = vadd.f32 %v325_v13, %v242_v20 }
  0xb2   :  { %v331_v61 = vpop.permute.xlu1 %330  ;;  %v329_v51 = vpop.permute.xlu0 %328 }
  0xb3   :  { %v1196_v60 = vadd.f32 %v331_v61, %v245_v40  ;;  %v1198_v29 = vadd.f32 %v329_v51, %v244_v62 }
  0xb6   :  { %v335_v48 = vpop.permute.xlu1 %334  ;;  %v333_v35 = vpop.permute.xlu0 %332 }
  0xb7   :  { %v1202_v58 = vadd.f32 %v335_v48, %v247_v46  ;;  %v1204_v18 = vadd.f32 %v333_v35, %v246_v24 }
  0xba   :  { %v339_v22 = vpop.permute.xlu1 %338  ;;  %v337_v43 = vpop.permute.xlu0 %336 }
  0xbb   :  { %v1208_v0 = vadd.f32 %v339_v22, %v249_v26  ;;  %v1210_v42 = vadd.f32 %v337_v43, %v248_v39 }
  0xbe   :  { %v367_v47 = vpop.permute.xlu1 %366  ;;  %v365_v30 = vpop.permute.xlu0 %364 }
  0xbf   :  { %v401_v8 = vadd.f32 %v367_v47, %v353_v21  ;;  %v400_v41 = vadd.f32 %v365_v30, %v352_v23 }
  0xc1   :  { %v468_v40 = vadd.f32 %v1104_v15, %v401_v8  ;;  %v467_v62 = vadd.f32 %v1107_v16, %v400_v41 }
  0xc2   :  { %v371_v36 = vpop.permute.xlu1 %370  ;;  %v369_v44 = vpop.permute.xlu0 %368 }
  0xc3   :  { %v403_v10 = vadd.f32 %v371_v36, %v355_v31  ;;  %v402_v13 = vadd.f32 %v369_v44, %v354_v5 }
  0xc5   :  { %v470_v21 = vadd.f32 %v1119_v50, %v403_v10  ;;  %v469_v23 = vadd.f32 %v1115_v19, %v402_v13 }
  0xc6   :  { %v375_v57 = vpop.permute.xlu1 %374  ;;  %v373_v49 = vpop.permute.xlu0 %372 }
  0xc7   :  { %v405_v46 = vadd.f32 %v375_v57, %v357_v11  ;;  %v404_v24 = vadd.f32 %v373_v49, %v356_v28 }
  0xc9   :  { %v472_v15 = vadd.f32 %v1130_v55, %v405_v46  ;;  %v471_v16 = vadd.f32 %v1133_v7, %v404_v24 }
  0xca   :  { %v379_v37 = vpop.permute.xlu1 %378  ;;  %v377_v52 = vpop.permute.xlu0 %376 }
  0xcb   :  { %v407_v28 = vadd.f32 %v379_v37, %v1196_v60  ;;  %v406_v50 = vadd.f32 %v377_v52, %v1198_v29 }
  0xcd   :  { %v474_v57 = vadd.f32 %v1145_v56, %v407_v28  ;;  %v473_v60 = vadd.f32 %v1141_v53, %v406_v50 }
  0xce   :  { %v383_v9 = vpop.permute.xlu1 %382  ;;  %v381_v54 = vpop.permute.xlu0 %380 }
  0xcf   :  { %v409_v36 = vadd.f32 %v383_v9, %v1202_v58  ;;  %v408_v55 = vadd.f32 %v381_v54, %v1204_v18 }
  0xd1   :  { %v475_v58 = vadd.f32 %v1158_v2, %v408_v55 }
  0xd2   :  { %v1212_v33 = vpop.permute.xlu1 %386  ;;  %v1214_v34 = vpop.permute.xlu0 %384 }
  0xd3   :  { %v411_v54 = vadd.f32 %v1212_v33, %v1208_v0  ;;  %v410_v53 = vadd.f32 %v1214_v34, %v1210_v42 }
  0xd5   :  { %v478_v2 = vadd.f32 %v1168_v38, %v411_v54 }
  0xd6   :  { %v512_v45 = vpop.permute.xlu1 %511  ;;  %v510_v63 = vpop.permute.xlu0 %509 }
  0xd7   :  { %v546_v61 = vadd.f32 %v512_v45, %v468_v40  ;;  %v545_v51 = vadd.f32 %v510_v63, %v467_v62  ;;  %v476_v45 = vadd.f32 %v1155_v12, %v409_v36 }
  0xda   :  { %v516_v59 = vpop.permute.xlu1 %515  ;;  %v514_v3 = vpop.permute.xlu0 %513 }
  0xdb   :  { %v548_v22 = vadd.f32 %v516_v59, %v470_v21  ;;  %v547_v31 = vadd.f32 %v514_v3, %v469_v23 }
  0xde   :  { %v520_v6 = vpop.permute.xlu1 %519  ;;  %v518_v32 = vpop.permute.xlu0 %517 }
  0xdf   :  { %v550_v47 = vadd.f32 %v520_v6, %v472_v15  ;;  %v549_v30 = vadd.f32 %v518_v32, %v471_v16  ;;  %v477_v32 = vadd.f32 %v1171_v1, %v410_v53 }
  0xe2   :  { %v524_v27 = vpop.permute.xlu1 %523  ;;  %v522_v25 = vpop.permute.xlu0 %521 }
  0xe3   :  { %v552_v37 = vadd.f32 %v524_v27, %v474_v57  ;;  %v551_v52 = vadd.f32 %v522_v25, %v473_v60 }
  0xe6   :  { %v528_v14 = vpop.permute.xlu1 %527  ;;  %v526_v17 = vpop.permute.xlu0 %525 }
  0xe7   :  { %v554_v59 = vadd.f32 %v528_v14, %v476_v45  ;;  %v553_v3 = vadd.f32 %v526_v17, %v475_v58 }
  0xea   :  { %v1216_v4 = vpop.permute.xlu1 %531  ;;  %v1218_v20 = vpop.permute.xlu0 %529 }
  0xeb   :  { %v556_v0 = vadd.f32 %v1216_v4, %v478_v2  ;;  %v555_v42 = vadd.f32 %v1218_v20, %v477_v32 }
  0xee   :  { %v560_v48 = vpop.permute.xlu1 %559  ;;  %v558_v35 = vpop.permute.xlu0 %557 }
  0xef   :  { %v594_v26 = vadd.f32 %v560_v48, %v546_v61  ;;  %v593_v39 = vadd.f32 %v558_v35, %v545_v51 }
  0xf1   :  { %607 = vst.msk [vmem:[#allocation2 + $0x8] sm:$0xff] %vm605_vm2, %v594_v26  ;;  %606 = vst.msk [vmem:[#allocation2] sm:$0xff] %vm605_vm2, %v593_v39 }
  0xf2   :  { %v564_v5 = vpop.permute.xlu1 %563  ;;  %v562_v11 = vpop.permute.xlu0 %561 }
  0xf3   :  { %v596_v43 = vadd.f32 %v564_v5, %v548_v22  ;;  %v595_v19 = vadd.f32 %v562_v11, %v547_v31 }
  0xf5   :  { %609 = vst.msk [vmem:[#allocation2 + $0x18] sm:$0xff] %vm605_vm2, %v596_v43  ;;  %608 = vst.msk [vmem:[#allocation2 + $0x10] sm:$0xff] %vm605_vm2, %v595_v19 }
  0xf6   :  { %v568_v44 = vpop.permute.xlu1 %567  ;;  %v566_v7 = vpop.permute.xlu0 %565 }
  0xf7   :  { %v598_v49 = vadd.f32 %v568_v44, %v550_v47  ;;  %v597_v29 = vadd.f32 %v566_v7, %v549_v30 }
  0xf9   :  { %611 = vst.msk [vmem:[#allocation2 + $0x28] sm:$0xff] %vm605_vm2, %v598_v49  ;;  %610 = vst.msk [vmem:[#allocation2 + $0x20] sm:$0xff] %vm605_vm2, %v597_v29 }
  0xfa   :  { %v572_v9 = vpop.permute.xlu1 %571  ;;  %v570_v18 = vpop.permute.xlu0 %569 }
  0xfb   :  { %v600_v56 = vadd.f32 %v572_v9, %v552_v37  ;;  %v599_v63 = vadd.f32 %v570_v18, %v551_v52 }
  0xfd   :  { %613 = vst.msk [vmem:[#allocation2 + $0x38] sm:$0xff] %vm605_vm2, %v600_v56  ;;  %612 = vst.msk [vmem:[#allocation2 + $0x30] sm:$0xff] %vm605_vm2, %v599_v63 }
  0xfe   :  { %v576_v6 = vpop.permute.xlu1 %575  ;;  %v574_v12 = vpop.permute.xlu0 %573 }
  0xff   :  { %v602_v27 = vadd.f32 %v576_v6, %v554_v59  ;;  %v601_v25 = vadd.f32 %v574_v12, %v553_v3 }
 0x101   :  { %615 = vst.msk [vmem:[#allocation2 + $0x48] sm:$0xff] %vm605_vm2, %v602_v27  ;;  %614 = vst.msk [vmem:[#allocation2 + $0x40] sm:$0xff] %vm605_vm2, %v601_v25 }
 0x102   :  { %v580_v33 = vpop.permute.xlu1 %579  ;;  %v578_v34 = vpop.permute.xlu0 %577 }
 0x103   :  { %v604_v14 = vadd.f32 %v580_v33, %v556_v0  ;;  %v603_v17 = vadd.f32 %v578_v34, %v555_v42 }
 0x105   :  { %617 = vst.msk [vmem:[#allocation2 + $0x58] sm:$0xff] %vm605_vm2, %v604_v14  ;;  %616 = vst.msk [vmem:[#allocation2 + $0x50] sm:$0xff] %vm605_vm2, %v603_v17 }
 0x106   :  { %650 = shalt.err (!%p647_p4)
}
 0x107   :  { %s651_s19 = scalar_lea.hbm %s1267_s1, 1536 }
 0x108   :  { %p652_p5 = scmp.ne.s32.totalorder %s1267_s1, %s651_s19  ;;  %p655_p6 = scmp.lt.u32.totalorder %s651_s19, %s1267_s1 }
 0x10a   :  { %p657_p7 = pnand %p655_p6, %p652_p5 }
 0x10c   :  { %660 = shalt.err (!%p657_p7)
}
 0x10d   :  { %s666_s24 = smov 128   ;;  %s667_s25 = smov 8  }
 0x10e   :  { %629 = dma.vmem_to_hbm [thread:$0]  %s624_s14, 1536, %s1267_s1, [#allocation3], %s666_s24, %s666_s24, %s667_s25  }
 0x10f   :  { %661 = dma.done.wait [#allocation3], 1536  }
 0x110   :  { %662 = vsyncadd [#allocation3], 4294965760 }
 0x111   :  { %633 = vsyncpa [#allocation3], 1 }

</bundles_post_ra>
